<compile_context>
chip_gen: v5e
topology: v5e:2x2
jax: 0.10.0
libtpu: 0.0.40
codegen_flags: <defaults>
</compile_context>

<pallas_src>
import functools

import jax
import jax.numpy as jnp
from jax import lax
from jax.experimental import pallas as pl
from jax.experimental.pallas import tpu as pltpu


def _round_up(x, m):
    return (x + m - 1) // m * m


def _upsample_block_kernel(xp_ref, w1_ref, w2_ref, out_ref, *,
                           H, W, CK, Cout, is_norm, eps, slope):
    # xp_ref : (1, CK, Lpad)  flattened upsampled input, one zero pad-row (W lanes) at the
    #                         front, zeros at the back; channels padded to CK (mult of 8)
    # w1_ref : (Cout, 9*CK)   3x3 conv weight, K index = (dh*3+dw)*CK + ci
    # w2_ref : (Cout, Cout)   1x1 conv weight [out, in]
    # out_ref: (1, Cout, H*W) lane-dense output slab
    HW = H * W
    x = xp_ref[0]                       # (CK, Lpad)
    Lpad = x.shape[1]

    # Column masks for the horizontal conv boundary: the flattened-spatial shift trick wraps
    # across rows, so dw==0 taps must not contribute at w==0 and dw==2 taps at w==W-1.
    col = lax.broadcasted_iota(jnp.int32, (CK, HW), 1) % W
    mask_l = (col != 0).astype(jnp.float32)
    mask_r = (col != (W - 1)).astype(jnp.float32)

    # Build the (9*CK, HW) im2col slab with 9 lane rotations (XLU, essentially free).
    patches = []
    for dh in range(3):
        for dw in range(3):
            s = dh * W + (dw - 1)       # flat shift of this tap (vertical pad row handles dh)
            shifted = x if s == 0 else pltpu.roll(x, (-s) % Lpad, axis=1)
            p = shifted[:, :HW]         # aligned slice (HW is the leading lanes)
            if dw == 0:
                p = p * mask_l
            elif dw == 2:
                p = p * mask_r
            patches.append(p)
    b9 = jnp.concatenate(patches, axis=0)                 # (9*CK, HW)

    # 3x3 conv as a single MXU matmul, f32 accumulation.
    acc = jnp.dot(w1_ref[...], b9, preferred_element_type=jnp.float32)   # (Cout, HW)

    # InstanceNorm2d (affine=False, biased variance) as a lane reduction.
    if is_norm:
        mean = jnp.mean(acc, axis=1, keepdims=True)
        var = jnp.mean((acc - mean) ** 2, axis=1, keepdims=True)
        acc = (acc - mean) * lax.rsqrt(var + eps)

    # LeakyReLU(0.1)
    acc = jnp.where(acc > 0, acc, slope * acc)

    # 1x1 conv == channel matmul: (Cout, Cout) @ (Cout, HW).
    out = jnp.dot(w2_ref[...], acc, preferred_element_type=jnp.float32)
    out_ref[0] = out.astype(out_ref.dtype)                 # lane-dense store


def _nearest_upsample_nchw(x, out_size):
    # PyTorch nn.Upsample(mode='nearest'): src = floor(dst * in / out)
    if isinstance(out_size, int):
        out_h = out_w = out_size
    else:
        out_h, out_w = out_size
    _, _, H, W = x.shape
    h_idx = (jnp.arange(out_h) * H) // out_h
    w_idx = (jnp.arange(out_w) * W) // out_w
    return x[:, :, h_idx, :][:, :, :, w_idx]


def upsample_block_pallas(x_nchw, w1_oihw, w2_oihw, out_size,
                          is_norm=True, eps=1e-5, slope=0.1):
    """Forward pass of UpsampleBlock. NCHW in, NCHW out."""
    x = _nearest_upsample_nchw(x_nchw.astype(jnp.float32), out_size)   # (B, Cin, H, W)
    B, Cin, H, W = x.shape
    Cout = w1_oihw.shape[0]
    HW = H * W
    CK = _round_up(Cin, 8)                      # sublane-aligned channel block
    Lpad = _round_up((H + 2) * W, 128)          # flat spatial extent incl. top/bottom pad rows

    # Flattened, vertically zero-padded, channel-padded input: (B, CK, Lpad).
    xp = jnp.pad(x.reshape(B, Cin, HW),
                 ((0, 0), (0, CK - Cin), (W, Lpad - W - HW)))

    # conv_1 weight (Cout, Cin, 3, 3) -> (Cout, 9*CK) with K = (dh*3+dw)*CK + ci.
    w1_k = jnp.transpose(w1_oihw.astype(jnp.float32), (2, 3, 1, 0))    # (3, 3, Cin, Cout)
    w1_k = jnp.pad(w1_k, ((0, 0), (0, 0), (0, CK - Cin), (0, 0)))      # (3, 3, CK, Cout)
    w1_mat = w1_k.reshape(9 * CK, Cout).T                              # (Cout, 9*CK)

    # conv_2 weight (Cout, Cout, 1, 1) -> (out, in) matrix.
    w2_mat = w2_oihw[:, :, 0, 0].astype(jnp.float32)

    kernel = functools.partial(
        _upsample_block_kernel,
        H=H, W=W, CK=CK, Cout=Cout, is_norm=is_norm, eps=eps, slope=slope)

    out_flat = pl.pallas_call(
        kernel,
        out_shape=jax.ShapeDtypeStruct((B, Cout, HW), jnp.float32),
        grid_spec=pltpu.PrefetchScalarGridSpec(
            num_scalar_prefetch=0,
            grid=(B,),
            in_specs=[
                pl.BlockSpec((1, CK, Lpad), lambda b: (b, 0, 0)),
                pl.BlockSpec((Cout, 9 * CK), lambda b: (0, 0)),
                pl.BlockSpec((Cout, Cout), lambda b: (0, 0)),
            ],
            out_specs=pl.BlockSpec((1, Cout, HW), lambda b: (b, 0, 0)),
        ),
        compiler_params=pltpu.CompilerParams(
            dimension_semantics=("parallel",)),
    )(xp, w1_mat, w2_mat)

    # (B, Cout, H*W) -> (B, Cout, H, W): pure reshape, no transpose needed.
    return out_flat.reshape(B, Cout, H, W)


def upsample_block_reference(x_nchw, w1_oihw, w2_oihw, out_size,
                             is_norm=True, eps=1e-5, slope=0.1):
    """Pure-JAX reference mirroring the PyTorch module (for correctness check)."""
    x = _nearest_upsample_nchw(x_nchw.astype(jnp.float32), out_size)
    dn = ('NCHW', 'OIHW', 'NCHW')
    out = lax.conv_general_dilated(x, w1_oihw.astype(jnp.float32), (1, 1), 'SAME',
                                   dimension_numbers=dn)
    if is_norm:
        mean = jnp.mean(out, axis=(2, 3), keepdims=True)
        var = jnp.mean((out - mean) ** 2, axis=(2, 3), keepdims=True)
        out = (out - mean) * lax.rsqrt(var + eps)
    out = jnp.where(out > 0, out, slope * out)
    out = lax.conv_general_dilated(out, w2_oihw.astype(jnp.float32), (1, 1), 'VALID',
                                   dimension_numbers=dn)
    return out


if __name__ == "__main__":
    in_channel, out_channel, out_size = 4, 8, 32
    B, H_in, W_in = 2, 16, 16

    key = jax.random.PRNGKey(0)
    kx, kw1, kw2 = jax.random.split(key, 3)
    x = jax.random.normal(kx, (B, in_channel, H_in, W_in), dtype=jnp.float32)
    # Deterministic synthetic weights with the PyTorch parameter shapes:
    w1 = jax.random.normal(kw1, (out_channel, in_channel, 3, 3), dtype=jnp.float32) * 0.1
    w2 = jax.random.normal(kw2, (out_channel, out_channel, 1, 1), dtype=jnp.float32) * 0.1

    out = upsample_block_pallas(x, w1, w2, out_size, is_norm=True)
    out = jax.block_until_ready(out)

    ref = upsample_block_reference(x, w1, w2, out_size, is_norm=True)
    assert out.shape == (B, out_channel, out_size, out_size), out.shape
    assert jnp.allclose(out, ref, rtol=1e-4, atol=1e-4), float(jnp.max(jnp.abs(out - ref)))

    print("KERNEL_OK")
</pallas_src>

<mosaic_0001>
module attributes {stable_mosaic.version = 11 : i64} {
  func.func @_upsample_block_kernel(%arg0: i32, %arg1: memref<1x8x1152xf32, #tpu.memory_space<vmem>>, %arg2: memref<8x72xf32, #tpu.memory_space<vmem>>, %arg3: memref<8x8xf32, #tpu.memory_space<vmem>>, %arg4: memref<1x8x1024xf32, #tpu.memory_space<vmem>>) attributes {dimension_semantics = [#tpu.dimension_semantics<parallel>], iteration_bounds = array<i64: 2>, scalar_prefetch = 0 : i64, scratch_operands = 0 : i64, tpu.core_type = #tpu.core_type<tc>, window_params = [{transform_indices = @transform_0, window_bounds = array<i64: 1, 8, 1152>}, {pipeline_mode = #tpu.pipeline_mode<synchronous>, transform_indices = @transform_1, window_bounds = array<i64: 8, 72>}, {pipeline_mode = #tpu.pipeline_mode<synchronous>, transform_indices = @transform_2, window_bounds = array<i64: 8, 8>}, {transform_indices = @transform_3, window_bounds = array<i64: 1, 8, 1024>}]} {
    %c0 = arith.constant 0 : index
    %c0_0 = arith.constant 0 : index
    %c0_1 = arith.constant 0 : index
    %0 = vector.load %arg1[%c0, %c0_0, %c0_1] : memref<1x8x1152xf32, #tpu.memory_space<vmem>>, vector<1x8x1152xf32>
    %1 = vector.shape_cast %0 : vector<1x8x1152xf32> to vector<8x1152xf32>
    %2 = tpu.iota {dimensions = array<i32: 1>} : vector<8x1024xi32>
    %c32_i32 = arith.constant 32 : i32
    %c0_i32 = arith.constant 0 : i32
    %3 = arith.cmpi eq, %c32_i32, %c0_i32 : i32
    %c1_i32 = arith.constant 1 : i32
    %4 = arith.select %3, %c1_i32, %c32_i32 : i32
    %5 = vector.broadcast %4 : i32 to vector<8x1024xi32>
    %6 = arith.remsi %2, %5 : vector<8x1024xi32>
    %c0_i32_2 = arith.constant 0 : i32
    %7 = vector.broadcast %c0_i32_2 : i32 to vector<8x1024xi32>
    %8 = arith.cmpi ne, %6, %7 : vector<8x1024xi32>
    %c0_i32_3 = arith.constant 0 : i32
    %9 = vector.broadcast %c0_i32_3 : i32 to vector<8x1024xi32>
    %10 = arith.cmpi slt, %6, %9 : vector<8x1024xi32>
    %c0_i32_4 = arith.constant 0 : i32
    %11 = arith.cmpi slt, %4, %c0_i32_4 : i32
    %12 = vector.broadcast %11 : i1 to vector<8x1024xi1>
    %13 = vector.broadcast %12 : vector<8x1024xi1> to vector<8x1024xi1>
    %14 = arith.xori %10, %13 : vector<8x1024xi1>
    %15 = arith.andi %14, %8 : vector<8x1024xi1>
    %16 = vector.broadcast %4 : i32 to vector<8x1024xi32>
    %17 = arith.addi %6, %16 : vector<8x1024xi32>
    %18 = arith.select %15, %17, %6 : vector<8x1024xi1>, vector<8x1024xi32>
    %c0_i32_5 = arith.constant 0 : i32
    %19 = vector.broadcast %c0_i32_5 : i32 to vector<8x1024xi32>
    %20 = arith.cmpi ne, %18, %19 : vector<8x1024xi32>
    %21 = arith.extui %20 : vector<8x1024xi1> to vector<8x1024xi32>
    %22 = arith.sitofp %21 : vector<8x1024xi32> to vector<8x1024xf32>
    %c31_i32 = arith.constant 31 : i32
    %23 = vector.broadcast %c31_i32 : i32 to vector<8x1024xi32>
    %24 = arith.cmpi ne, %18, %23 : vector<8x1024xi32>
    %25 = arith.extui %24 : vector<8x1024xi1> to vector<8x1024xi32>
    %26 = arith.sitofp %25 : vector<8x1024xi32> to vector<8x1024xf32>
    %c1_i32_6 = arith.constant 1 : i32
    %27 = tpu.dynamic_rotate %1 by %c1_i32_6 dim 1 : vector<8x1152xf32>, i32 -> vector<8x1152xf32>
    %28 = vector.extract_strided_slice %27 {offsets = [0, 0], sizes = [8, 1024], strides = [1, 1]} : vector<8x1152xf32> to vector<8x1024xf32>
    %29 = arith.mulf %28, %22 : vector<8x1024xf32>
    %30 = vector.extract_strided_slice %1 {offsets = [0, 0], sizes = [8, 1024], strides = [1, 1]} : vector<8x1152xf32> to vector<8x1024xf32>
    %c1151_i32 = arith.constant 1151 : i32
    %31 = tpu.dynamic_rotate %1 by %c1151_i32 dim 1 : vector<8x1152xf32>, i32 -> vector<8x1152xf32>
    %32 = vector.extract_strided_slice %31 {offsets = [0, 0], sizes = [8, 1024], strides = [1, 1]} : vector<8x1152xf32> to vector<8x1024xf32>
    %33 = arith.mulf %32, %26 : vector<8x1024xf32>
    %c1121_i32 = arith.constant 1121 : i32
    %34 = tpu.dynamic_rotate %1 by %c1121_i32 dim 1 : vector<8x1152xf32>, i32 -> vector<8x1152xf32>
    %35 = vector.extract_strided_slice %34 {offsets = [0, 0], sizes = [8, 1024], strides = [1, 1]} : vector<8x1152xf32> to vector<8x1024xf32>
    %36 = arith.mulf %35, %22 : vector<8x1024xf32>
    %c1120_i32 = arith.constant 1120 : i32
    %37 = tpu.dynamic_rotate %1 by %c1120_i32 dim 1 : vector<8x1152xf32>, i32 -> vector<8x1152xf32>
    %38 = vector.extract_strided_slice %37 {offsets = [0, 0], sizes = [8, 1024], strides = [1, 1]} : vector<8x1152xf32> to vector<8x1024xf32>
    %c1119_i32 = arith.constant 1119 : i32
    %39 = tpu.dynamic_rotate %1 by %c1119_i32 dim 1 : vector<8x1152xf32>, i32 -> vector<8x1152xf32>
    %40 = vector.extract_strided_slice %39 {offsets = [0, 0], sizes = [8, 1024], strides = [1, 1]} : vector<8x1152xf32> to vector<8x1024xf32>
    %41 = arith.mulf %40, %26 : vector<8x1024xf32>
    %c1089_i32 = arith.constant 1089 : i32
    %42 = tpu.dynamic_rotate %1 by %c1089_i32 dim 1 : vector<8x1152xf32>, i32 -> vector<8x1152xf32>
    %43 = vector.extract_strided_slice %42 {offsets = [0, 0], sizes = [8, 1024], strides = [1, 1]} : vector<8x1152xf32> to vector<8x1024xf32>
    %44 = arith.mulf %43, %22 : vector<8x1024xf32>
    %c1088_i32 = arith.constant 1088 : i32
    %45 = tpu.dynamic_rotate %1 by %c1088_i32 dim 1 : vector<8x1152xf32>, i32 -> vector<8x1152xf32>
    %46 = vector.extract_strided_slice %45 {offsets = [0, 0], sizes = [8, 1024], strides = [1, 1]} : vector<8x1152xf32> to vector<8x1024xf32>
    %c1087_i32 = arith.constant 1087 : i32
    %47 = tpu.dynamic_rotate %1 by %c1087_i32 dim 1 : vector<8x1152xf32>, i32 -> vector<8x1152xf32>
    %48 = vector.extract_strided_slice %47 {offsets = [0, 0], sizes = [8, 1024], strides = [1, 1]} : vector<8x1152xf32> to vector<8x1024xf32>
    %49 = arith.mulf %48, %26 : vector<8x1024xf32>
    %50 = tpu.concatenate %29, %30, %33, %36, %38, %41, %44, %46, %49 in 0 : vector<8x1024xf32>, vector<8x1024xf32>, vector<8x1024xf32>, vector<8x1024xf32>, vector<8x1024xf32>, vector<8x1024xf32>, vector<8x1024xf32>, vector<8x1024xf32>, vector<8x1024xf32> -> vector<72x1024xf32>
    %c0_7 = arith.constant 0 : index
    %c0_8 = arith.constant 0 : index
    %51 = vector.load %arg2[%c0_7, %c0_8] : memref<8x72xf32, #tpu.memory_space<vmem>>, vector<8x72xf32>
    %cst = arith.constant dense<0.000000e+00> : vector<8x1024xf32>
    %52 = tpu.matmul %51, %50, %cst {dimension_numbers = #tpu.dot_dimension_numbers<[1], [0], [0], [1], [0, 0, 1, 1], [], []>} : vector<8x72xf32>, vector<72x1024xf32>, vector<8x1024xf32> -> vector<8x1024xf32>
    %cst_9 = arith.constant dense<0.000000e+00> : vector<8xf32>
    %53 = vector.multi_reduction <add>, %52, %cst_9 [1] : vector<8x1024xf32> to vector<8xf32>
    %54 = vector.shape_cast %53 : vector<8xf32> to vector<8x1xf32>
    %cst_10 = arith.constant 1.024000e+03 : f32
    %55 = vector.broadcast %cst_10 : f32 to vector<8x1xf32>
    %56 = arith.divf %54, %55 : vector<8x1xf32>
    %57 = vector.broadcast %56 : vector<8x1xf32> to vector<8x1024xf32>
    %58 = arith.subf %52, %57 : vector<8x1024xf32>
    %59 = arith.mulf %58, %58 : vector<8x1024xf32>
    %cst_11 = arith.constant dense<0.000000e+00> : vector<8xf32>
    %60 = vector.multi_reduction <add>, %59, %cst_11 [1] : vector<8x1024xf32> to vector<8xf32>
    %61 = vector.shape_cast %60 : vector<8xf32> to vector<8x1xf32>
    %cst_12 = arith.constant 1.024000e+03 : f32
    %62 = vector.broadcast %cst_12 : f32 to vector<8x1xf32>
    %63 = arith.divf %61, %62 : vector<8x1xf32>
    %64 = vector.broadcast %56 : vector<8x1xf32> to vector<8x1024xf32>
    %65 = arith.subf %52, %64 : vector<8x1024xf32>
    %cst_13 = arith.constant 9.99999974E-6 : f32
    %66 = vector.broadcast %cst_13 : f32 to vector<8x1xf32>
    %67 = arith.addf %63, %66 : vector<8x1xf32>
    %68 = math.rsqrt %67 : vector<8x1xf32>
    %69 = vector.broadcast %68 : vector<8x1xf32> to vector<8x1024xf32>
    %70 = arith.mulf %65, %69 : vector<8x1024xf32>
    %cst_14 = arith.constant 0.000000e+00 : f32
    %71 = vector.broadcast %cst_14 : f32 to vector<8x1024xf32>
    %72 = arith.cmpf ogt, %70, %71 : vector<8x1024xf32>
    %cst_15 = arith.constant 1.000000e-01 : f32
    %73 = vector.broadcast %cst_15 : f32 to vector<8x1024xf32>
    %74 = arith.mulf %73, %70 : vector<8x1024xf32>
    %75 = arith.select %72, %70, %74 : vector<8x1024xi1>, vector<8x1024xf32>
    %c0_16 = arith.constant 0 : index
    %c0_17 = arith.constant 0 : index
    %76 = vector.load %arg3[%c0_16, %c0_17] : memref<8x8xf32, #tpu.memory_space<vmem>>, vector<8x8xf32>
    %cst_18 = arith.constant dense<0.000000e+00> : vector<8x1024xf32>
    %77 = tpu.matmul %76, %75, %cst_18 {dimension_numbers = #tpu.dot_dimension_numbers<[1], [0], [0], [1], [0, 0, 1, 1], [], []>} : vector<8x8xf32>, vector<8x1024xf32>, vector<8x1024xf32> -> vector<8x1024xf32>
    %c0_19 = arith.constant 0 : index
    %c0_20 = arith.constant 0 : index
    %c0_21 = arith.constant 0 : index
    %78 = vector.load %arg4[%c0_19, %c0_20, %c0_21] : memref<1x8x1024xf32, #tpu.memory_space<vmem>>, vector<1x8x1024xf32>
    %79 = vector.shape_cast %78 : vector<1x8x1024xf32> to vector<8x1024xf32>
    %80 = vector.shape_cast %77 : vector<8x1024xf32> to vector<1x8x1024xf32>
    tpu.vector_store %arg4[%c0_19, %c0_20, %c0_21], %80 {strides = array<i32>} : memref<1x8x1024xf32, #tpu.memory_space<vmem>>, vector<1x8x1024xf32>,
    return
  }
  func.func @transform_0(%arg0: i32) -> (i32, i32, i32) {
    %c0_i32 = arith.constant 0 : i32
    %c0_i32_0 = arith.constant 0 : i32
    %c0_i32_1 = arith.constant 0 : i32
    return %arg0, %c0_i32, %c0_i32_0 : i32, i32, i32
  }
  func.func @transform_1(%arg0: i32) -> (i32, i32) {
    %c0_i32 = arith.constant 0 : i32
    %c0_i32_0 = arith.constant 0 : i32
    %c0_i32_1 = arith.constant 0 : i32
    return %c0_i32, %c0_i32_0 : i32, i32
  }
  func.func @transform_2(%arg0: i32) -> (i32, i32) {
    %c0_i32 = arith.constant 0 : i32
    %c0_i32_0 = arith.constant 0 : i32
    %c0_i32_1 = arith.constant 0 : i32
    return %c0_i32, %c0_i32_0 : i32, i32
  }
  func.func @transform_3(%arg0: i32) -> (i32, i32, i32) {
    %c0_i32 = arith.constant 0 : i32
    %c0_i32_0 = arith.constant 0 : i32
    %c0_i32_1 = arith.constant 0 : i32
    return %arg0, %c0_i32, %c0_i32_0 : i32, i32, i32
  }
}

</mosaic_0001>

<bundles_post_ra>
// kernel: tpu_custom_call.1
= control target key start
LH: loop header
LB: loop body
LE: loop exit
PB: predicated region body
PF: predicated region fallthrough
CT: control target
= control target key end

     0   :  { %8 = vsyncpa [#allocation3], 0  ;;  %s2255_s0 = inlined_call_operand.hbm [shape: f32[2,8,1152], index: 0, kind: input, shape index: {}]   ;;  %s2256_s1 = inlined_call_operand.hbm [shape: f32[8,72], index: 1, kind: input, shape index: {}]   ;;  %s2257_s2 = inlined_call_operand.hbm [shape: f32[8,8], index: 2, kind: input, shape index: {}]   ;;  %s2258_s3 = inlined_call_operand.hbm [shape: f32[2,8,1024], index: 3, kind: output, shape index: {}]  }
   0x1   :  { %10 = vsyncpa [#allocation3 + $0x1], 0 }
   0x2   :  { %11 = vsyncpa [#allocation6], 0 }
   0x3   :  { %12 = vsyncpa [#allocation4], 0 }
   0x4   :  { %14 = vsyncpa [#allocation4 + $0x1], 0  ;;  %s1540_s12 = smov 0   ;;  %s1542_s13 = smov 0  }
   0x5   :  { %s1544_s14 = smov 0   ;;  %s1546_s15 = smov 0  }
   0x6 LB: > { %s1561_s16 = sadd.s32 4294967295, %s1506_s15   ;;  %s1174_s17 = sadd.s32 4294967294, %s1506_s15   ;;  %s1506_s15 = sphi %s1546_s15, %s2268_s15   ;;  %s1502_s14 = sphi %s1544_s14, %s2267_s14   ;;  %s1498_s13 = sphi %s1542_s13, %s2266_s13   ;;  %s1494_s12 = sphi %s1540_s12, %s2265_s12  }
   0x7   : > { %p40_p0 = scmp.ne.s32.totalorder %s1498_s13, %s1494_s12  ;;  %p41_p1 = scmp.eq.s32.totalorder %s1561_s16, 0 }
   0x8   : > { %p106_p2 = scmp.eq.s32.totalorder %s1561_s16, 1  ;;  %p112_p3 = scmp.eq.s32.totalorder %s1174_s17, 1 }
   0x9   : > { %p1570_p4 = por %p41_p1, %p40_p0  ;;  %p1175_p5 = scmp.ge.s32.totalorder %s1506_s15, 1 }
   0xa   : > { %p1575_p6 = por %p112_p3, %p40_p0  ;;  %p119_p7 = scmp.lt.s32.totalorder %s1506_s15, 3 }
   0xb   : > { %s131_s22 = sshll.u32 %s2256_s1, 4  ;;  %s1508_s24 = smov [#allocation5]   ;;  %s132_s22 = int_to_ptr.hbm [resolvable:$true] %s131_s22 }
   0xc   : > { %p1583_p8 = pnand %p1175_p5, %p119_p7  ;;  %s133_s25 = sshll.u32 %s1508_s24, 4  ;;  %s134_s25 = int_to_ptr.vmem [resolvable:$true] %s133_s25 }
   0xd   : > { %s143_s28 = sshll.u32 %s2257_s2, 4  ;;  %s1509_s29 = smov [#allocation7]   ;;  %s144_s28 = int_to_ptr.hbm [resolvable:$true] %s143_s28 }
   0xe   : > { %p1237_p10 = pneg %p1583_p8  ;;  %s145_s30 = sshll.u32 %s1509_s29, 4  ;;  %s146_s30 = int_to_ptr.vmem [resolvable:$true] %s145_s30 }
   0xf   : > { %s1596_s4 = sadd.s32 1, %s1506_s15   ;;  %s27_s5 = sadd.s32 1, %s1502_s14 }
  0x10   : > { %p1238_p11 = pnand %p1237_p10, %p41_p1  ;;  %s24_s6 = ssub.s32 %s1506_s15, %s1596_s4 }
  0x11   : > { %p34_p12 = scmp.ne.s32.totalorder %s1502_s14, %s1498_s13  ;;  %p25_p13 = scmp.eq.s32.totalorder %s24_s6, 0 }
  0x12   : > { %1240 = dma.hbm_to_vmem [thread:$0]  (!%p1238_p11), %s132_s22, 128, %s134_s25, [#allocation6]  }
  0x13   : > { %1243 = dma.hbm_to_vmem [thread:$0]  (!%p1238_p11), %s144_s28, 128, %s146_s30, [#allocation6]  }
  0x14   : > { %p35_p0 = scmp.eq.s32.totalorder %s1506_s15, 0  ;;  %p1606_p3 = por %p106_p2, %p34_p12 }
  0x15   : > { %p1254_p5 = scmp.lt.s32.totalorder %s1506_s15, 2  ;;  %s156_s9 = sand.u32 1, %s1502_s14  }
  0x16   : > { %s1612_s8 = scalar_select %p25_p13, %s1502_s14, %s27_s5  }
  0x17   : > { %p36_p7 = por %p35_p0, %p34_p12  ;;  %s1222_s10 = smul.u32 72, %s156_s9 }
  0x18   : > { %s1223_s11 = smul.u32 72, %s1506_s15  ;;  %s157_s27 = scalar_lea.sflag [#allocation3], %s156_s9 }
  0x19   : > { %p1616_p10 = pnand %p1254_p5, %p36_p7  ;;  %s160_s24 = scalar_lea.vmem [#allocation2], %s1222_s10 }
  0x1a   : > { %s165_s22 = scalar_lea.hbm %s2255_s0, %s1223_s11  ;;  %s169_s25 = sshll.u32 %s160_s24, 4  ;;  %s170_s25 = int_to_ptr.vmem [resolvable:$true] %s169_s25 }
  0x1b   : > { %s167_s26 = sshll.u32 %s165_s22, 4  ;;  %p1410_p11 = pneg %p1616_p10  ;;  %s168_s26 = int_to_ptr.hbm [resolvable:$true] %s167_s26 }
  0x1c   : > { %s1406_s28 = sshra.s32 %s168_s26, 4  ;;  %s1413_s6 = scalar_lea.hbm %s2255_s0, 144  ;;  %s1407_s28 = int_to_ptr.hbm [resolvable:$true] %s1406_s28 }
  0x1d   : > { %s1408_s29 = scalar_lea.hbm %s1407_s28, 72  ;;  %p1414_p0 = scmp.lt.s32.totalorder %s1407_s28, %s2255_s0 }
  0x1e   : > { %p1409_p2 = scmp.ne.s32.totalorder %s1407_s28, %s1408_s29  ;;  %p1415_p5 = scmp.lt.s32.totalorder %s1413_s6, %s1408_s29 }
  0x20   : > { %p1411_p12 = pnand %p1410_p11, %p1409_p2  ;;  %p1416_p7 = por %p1415_p5, %p1414_p0 }
  0x22   : > { %p1412_p13 = pneg %p1411_p12 }
  0x24   : > { %p1417_p9 = pnand %p1416_p7, %p1412_p13 }
  0x26   : > { %1420 = shalt.err (!%p1417_p9)
}
  0x27   : > { %1247 = dma.hbm_to_vmem [thread:$0]  (!%p1616_p10), %s168_s26, 1152, %s170_s25, %s157_s27  }
  0x28   : > { %178 = sbr.rel (%p1583_p8) target bundleno = 895 (0x37f), region = 32  ;;  %s1636_s9 = sand.u32 (!%p1583_p8), 1, %s1498_s13  }
  0x29   : > { %s1224_s10 = smul.u32 (!%p1583_p8), 72, %s1636_s9  ;;  %s181_s21 = scalar_lea.sflag (!%p1583_p8), [#allocation3], %s1636_s9 }
  0x2b   : > { %s1640_s22 = scalar_lea.vmem (!%p1583_p8), [#allocation2], %s1224_s10 }
  0x2d   : > { %1481 = dma.done.wait (%p1570_p4), %s181_s21, 1152  }
  0x2e   : > { %1483 = vsyncadd (%p1570_p4), %s181_s21, 4294966144 }
  0x2f   : > { %1485 = dma.done.wait (%p41_p1), [#allocation6], 256  }
  0x30   : > { %1487 = vsyncadd (%p41_p1), [#allocation6], 4294967040  ;;  %v1651_v0 = vld [vmem:[%s1640_s22 + $0x20] sm:$0xff]  ;;  %v1654_v1 = vld [vmem:[%s1640_s22 + $0x10] sm:$0xff]  ;;  %s1510_s23 = smov 63   ;;  %s1511_s18 = smov 65   ;;  %v227_v15 = vlaneseq }
  0x31   : > { %v1657_v2 = vld [vmem:[%s1640_s22] sm:$0xff]  ;;  %617 = vrot.lane.b32.xlu2 %v1651_v0, %s1510_s23  ;;  %613 = vrot.lane.b32.xlu0 %v1654_v1, %s1510_s23  ;;  %v1666_v3 = vld [vmem:[%s1640_s22 + $0x18] sm:$0xff]  ;;  %s1512_s17 = smov 95   ;;  %s1513_s24 = smov 64   ;;  %v1518_v28 = vmov 0.0  }
  0x32   : > { %609 = vrot.lane.b32.xlu1 %v1657_v2, %s1510_s23  ;;  %v1669_v4 = vld [vmem:[%s1640_s22 + $0x8] sm:$0xff]  ;;  %v1302_v5 = vpack.i.bf16 %v1666_v3, %v1654_v1  ;;  %v1691_v6 = vld [vmem:[%s1640_s22 + $0x30] sm:$0xff]  ;;  %v1708_v9 = vld [vmem:[%s1640_s22 + $0x38] sm:$0xff]  ;;  %s1514_s25 = smov 97   ;;  %s1515_s26 = smov 96   ;;  %v1771_v17 = vand.u32 127, %v227_v15 }
  0x33   : > { %v1312_v7 = vpack.i.bf16 %v1691_v6, %v1651_v0  ;;  %v1307_v8 = vpack.i.bf16 %v1669_v4, %v1657_v2  ;;  %v1717_v10 = vld [vmem:[%s1640_s22 + $0x28] sm:$0xff]  ;;  %v1725_v11 = vld [vmem:[%s1640_s22 + $0x40] sm:$0xff]  ;;  %s1516_s27 = smov 127   ;;  %s1517_s28 = smov 1  }
  0x34   : > { %v1745_v12 = vpack.i.bf16 %v1717_v10, %v1708_v9  ;;  %v230_v18 = vadd.s32 256, %v1771_v17  ;;  %v1775_v19 = vadd.s32 384, %v1771_v17  ;;  %v1778_v20 = vadd.s32 128, %v1771_v17  ;;  %s1183_s29 = sshll.u32 %s1636_s9, 6  ;;  %s1221_s5 = sshll.u32 %s1561_s16, 6 }
  0x35   : > { %v240_v26 = vand.u32 31, %v1771_v17  ;;  %vm627_vm4 = vcmp.lt.s32.totalorder %v1771_v17, 63  ;;  %vm565_vm5 = vcmp.lt.s32.totalorder %v1771_v17, 65  ;;  %vm600_vm7 = vcmp.lt.s32.totalorder %v1771_v17, 64  ;;  %s217_s30 = scalar_lea.vmem [#allocation8], %s1183_s29  ;;  %s1080_s11 = scalar_lea.hbm %s2258_s3, %s1221_s5 }
  0x36   : > { %v254_v23 = vand.u32 31, %v230_v18  ;;  %v261_v24 = vand.u32 31, %v1775_v19  ;;  %v247_v27 = vand.u32 31, %v1778_v20  ;;  %vm530_vm8 = vcmp.lt.s32.totalorder %v1771_v17, 95  ;;  %s1082_s10 = sshll.u32 %s217_s30, 4  ;;  %s1084_s21 = sshll.u32 %s1080_s11, 4  ;;  %s1083_s10 = int_to_ptr.vmem [resolvable:$true] %s1082_s10  ;;  %s1085_s21 = int_to_ptr.hbm [resolvable:$true] %s1084_s21 }
  0x37   : > { %vm356_vm2 = vcmp.ne.s32.totalorder %v240_v26, 31  ;;  %vm332_vm10 = vcmp.ne.s32.totalorder %v240_v26, 0  ;;  %vm468_vm12 = vcmp.lt.s32.totalorder %v1771_v17, 97  ;;  %vm503_vm13 = vcmp.lt.s32.totalorder %v1771_v17, 96  ;;  %s1069_s16 = scalar_lea.sflag [#allocation4], %s1636_s9  ;;  %s1450_s22 = sshra.s32 %s1085_s21, 4  ;;  %s1451_s22 = int_to_ptr.hbm [resolvable:$true] %s1450_s22 }
  0x38   : > { %vm358_vm0 = vcmp.ne.s32.totalorder %v254_v23, 31  ;;  %vm359_vm1 = vcmp.ne.s32.totalorder %v261_v24, 31  ;;  %vm357_vm3 = vcmp.ne.s32.totalorder %v247_v27, 31  ;;  %v1809_v33 = vsel %vm356_vm2, 1.0, %v1518_v28  ;;  %p1457_p9 = scmp.lt.s32.totalorder %s1451_s22, %s2258_s3 }
  0x39   : > { %551 = vrot.lane.b32.xlu2 %v1654_v1, %s1511_s18  ;;  %615 = vrot.lane.b32.xlu0 %v1666_v3, %s1510_s23  ;;  %v1801_v29 = vsel %vm358_vm0, 1.0, %v1518_v28  ;;  %v1804_v30 = vsel %vm359_vm1, 1.0, %v1518_v28  ;;  %v1812_v34 = vsel %vm357_vm3, 1.0, %v1518_v28  ;;  %vm334_vm6 = vcmp.ne.s32.totalorder %v254_v23, 0 }
  0x3a   : > { %611 = vrot.lane.b32.xlu1 %v1669_v4, %s1510_s23  ;;  %v1842_v51 = vsel %vm334_vm6, 1.0, %v1518_v28  ;;  %vm335_vm9 = vcmp.ne.s32.totalorder %v261_v24, 0  ;;  %vm333_vm11 = vcmp.ne.s32.totalorder %v247_v27, 0  ;;  %vm433_vm14 = vcmp.lt.s32.totalorder %v1771_v17, 127 }
  0x3b   : > { %v1871_v60 = vsel %vm335_vm9, 1.0, %v1518_v28  ;;  %vm398_vm1 = vcmp.lt.s32.totalorder %v1771_v17, 1 }
  0x41   : > { %516 = vrot.lane.b32.xlu2 %v1654_v1, %s1512_s17  ;;  %553 = vrot.lane.b32.xlu0 %v1666_v3, %s1511_s18 }
  0x42   : > { %1303 = vrot.lane.b32.xlu1 %v1302_v5, %s1513_s24 }
  0x49   : > { %518 = vrot.lane.b32.xlu0 %v1666_v3, %s1512_s17  ;;  %549 = vrot.lane.b32.xlu2 %v1669_v4, %s1511_s18 }
  0x4a   : > { %547 = vrot.lane.b32.xlu1 %v1657_v2, %s1511_s18 }
  0x51   : > { %555 = vrot.lane.b32.xlu0 %v1651_v0, %s1511_s18  ;;  %1313 = vrot.lane.b32.xlu2 %v1312_v7, %s1513_s24 }
  0x52   : > { %1308 = vrot.lane.b32.xlu1 %v1307_v8, %s1513_s24 }
  0x59   : > { %520 = vrot.lane.b32.xlu2 %v1651_v0, %s1512_s17  ;;  %512 = vrot.lane.b32.xlu0 %v1657_v2, %s1512_s17 }
  0x5a   : > { %514 = vrot.lane.b32.xlu1 %v1669_v4, %s1512_s17 }
  0x61   : > { %454 = vrot.lane.b32.xlu2 %v1654_v1, %s1514_s25  ;;  %621 = vrot.lane.b32.xlu0 %v1691_v6, %s1510_s23 }
  0x62   : > { %623 = vrot.lane.b32.xlu1 %v1708_v9, %s1510_s23 }
  0x69   : > { %619 = vrot.lane.b32.xlu2 %v1717_v10, %s1510_s23  ;;  %456 = vrot.lane.b32.xlu0 %v1666_v3, %s1514_s25 }
  0x6a   : > { %1318 = vrot.lane.b32.xlu1 %v1302_v5, %s1515_s26 }
  0x71   : > { %421 = vrot.lane.b32.xlu2 %v1666_v3, %s1516_s27  ;;  %625 = vrot.lane.b32.xlu0 %v1725_v11, %s1510_s23  ;;  %s1452_s23 = scalar_lea.hbm %s1451_s22, 64 }
  0x72   : > { %419 = vrot.lane.b32.xlu1 %v1654_v1, %s1516_s27  ;;  %p1453_p1 = scmp.ne.s32.totalorder %s1451_s22, %s1452_s23 }
  0x74   : > { %p1454_p4 = pnand %p1453_p1, %p1606_p3 }
  0x76   : > { %p1455_p8 = pneg %p1454_p4 }
  0x79   : > { %458 = vrot.lane.b32.xlu2 %v1651_v0, %s1514_s25  ;;  %450 = vrot.lane.b32.xlu0 %v1657_v2, %s1514_s25 }
  0x7a   : > { %452 = vrot.lane.b32.xlu1 %v1669_v4, %s1514_s25 }
  0x81   : > { %559 = vrot.lane.b32.xlu2 %v1691_v6, %s1511_s18  ;;  %1323 = vrot.lane.b32.xlu0 %v1307_v8, %s1515_s26  ;;  %v1886_v8 = vsel %vm332_vm10, 1.0, %v1518_v28 }
  0x82   : > { %1328 = vrot.lane.b32.xlu1 %v1312_v7, %s1515_s26 }
  0x89   : > { %415 = vrot.lane.b32.xlu2 %v1657_v2, %s1516_s27  ;;  %561 = vrot.lane.b32.xlu0 %v1708_v9, %s1511_s18 }
  0x8a   : > { %1333 = vrot.lane.b32.xlu1 %v1745_v12, %s1513_s24 }
  0x8b   : > { %v1753_v13 = vpop.permute.xlu2 %617 }
  0x91   : > { %524 = vrot.lane.b32.xlu2 %v1691_v6, %s1512_s17  ;;  %417 = vrot.lane.b32.xlu0 %v1669_v4, %s1516_s27 }
  0x92   : > { %423 = vrot.lane.b32.xlu1 %v1651_v0, %s1516_s27 }
  0x93   : > { %v1761_v14 = vpop.permute.xlu2 %551 }
  0x99   : > { %563 = vrot.lane.b32.xlu2 %v1725_v11, %s1511_s18  ;;  %526 = vrot.lane.b32.xlu0 %v1708_v9, %s1512_s17 }
  0x9a   : > { %557 = vrot.lane.b32.xlu1 %v1717_v10, %s1511_s18 }
  0x9b   : > { %v1769_v16 = vpop.permute.xlu2 %516 }
  0xa1   : > { %384 = vrot.lane.b32.xlu2 %v1654_v1, %s1517_s28  ;;  %598 = vrot.lane.b32.xlu0 %v1725_v11, %s1513_s24  ;;  %s1456_s24 = scalar_lea.hbm %s2258_s3, 128 }
  0xa2   : > { %382 = vrot.lane.b32.xlu1 %v1669_v4, %s1517_s28  ;;  %p1458_p10 = scmp.lt.s32.totalorder %s1456_s24, %s1452_s23 }
  0xa3   : > { %v614_v21 = vpop.permute.xlu0 %613  ;;  %v1786_v22 = vpop.permute.xlu2 %549 }
  0xa4   : > { %v610_v25 = vpop.permute.xlu1 %609  ;;  %v572_v20 = vsel %vm565_vm5, %v1786_v22, %v1761_v14  ;;  %p1459_p2 = por %p1458_p10, %p1457_p9 }
  0xa6   : > { %p1460_p11 = pnand %p1459_p2, %p1455_p8 }
  0xa9   : > { %380 = vrot.lane.b32.xlu2 %v1657_v2, %s1517_s28  ;;  %522 = vrot.lane.b32.xlu0 %v1717_v10, %s1512_s17 }
  0xaa   : > { %528 = vrot.lane.b32.xlu1 %v1725_v11, %s1512_s17 }
  0xab   : > { %v616_v31 = vpop.permute.xlu0 %615  ;;  %v1806_v32 = vpop.permute.xlu2 %1313 }
  0xac   : > { %v612_v35 = vpop.permute.xlu1 %611  ;;  %v633_v36 = vsel %vm627_vm4, %v614_v21, %v616_v31  ;;  %v632_v37 = vsel %vm627_vm4, %v616_v31, %v1753_v13  ;;  %v1315_v44 = vunpack.i.l.bf16 %v1806_v32 }
  0xad   : > { %v635_v38 = vsel %vm627_vm4, %v610_v25, %v612_v35  ;;  %v634_v39 = vsel %vm627_vm4, %v612_v35, %v614_v21  ;;  %v638_v40 = vmul.f32 %v1801_v29, %v633_v36  ;;  %v639_v41 = vmul.f32 %v1804_v30, %v632_v37 }
  0xae   : > { %v636_v42 = vmul.f32 %v1809_v33, %v635_v38  ;;  %v637_v43 = vmul.f32 %v1812_v34, %v634_v39  ;;  %v1900_v21 = vsel %vm333_vm11, 1.0, %v1518_v28  ;;  %vm645_vm11 = vcmask 588800  }
  0xaf   : > { %696 = vmatpush.msra.mxu2 %v638_v40  ;;  %716 = vmatpush.msra.mxu3 %v639_v41 }
  0xb0   : > { %656 = vmatpush.msra.mxu0 %v636_v42  ;;  %676 = vmatpush.msra.mxu1 %v637_v43 }
  0xb1   : > { %462 = vrot.lane.b32.xlu2 %v1691_v6, %s1514_s25  ;;  %386 = vrot.lane.b32.xlu0 %v1666_v3, %s1517_s28 }
  0xb2   : > { %396 = vrot.lane.b32.xlu1 %v1725_v11, %s1517_s28 }
  0xb3   : > { %v554_v45 = vpop.permute.xlu0 %553  ;;  %v1835_v46 = vpop.permute.xlu2 %520 }
  0xb4   : > { %v1304_v47 = vpop.permute.xlu1 %1303  ;;  %v571_v48 = vsel %vm565_vm5, %v1761_v14, %v554_v45  ;;  %v575_v14 = vmul.f32 %v1900_v21, %v572_v20 }
  0xb5   : > { %v1306_v49 = vunpack.i.h.bf16 %v1304_v47  ;;  %v1305_v50 = vunpack.i.l.bf16 %v1304_v47  ;;  %v576_v54 = vmul.f32 %v1842_v51, %v571_v48 }
  0xb7   : > { %v606_v52 = vsel %vm600_vm7, %v1305_v50, %v1306_v49  ;;  %v605_v53 = vsel %vm600_vm7, %v1306_v49, %v1315_v44 }
  0xb8   : > { %697 = vmatpush.msra.mxu2 %v606_v52  ;;  %717 = vmatpush.msra.mxu3 %v605_v53 }
  0xb9   : > { %427 = vrot.lane.b32.xlu2 %v1691_v6, %s1516_s27  ;;  %464 = vrot.lane.b32.xlu0 %v1708_v9, %s1514_s25 }
  0xba   : > { %1338 = vrot.lane.b32.xlu1 %v1745_v12, %s1515_s26  ;;  %698 = vmatpush.msra.mxu2 %v576_v54 }
  0xbb   : > { %v519_v55 = vpop.permute.xlu0 %518  ;;  %v1858_v56 = vpop.permute.xlu2 %454 }
  0xbc   : > { %v536_v57 = vsel %vm530_vm8, %v1769_v16, %v519_v55  ;;  %v548_v58 = vpop.permute.xlu1 %547 }
  0xbd   : > { %v541_v59 = vmul.f32 %v1801_v29, %v536_v57  ;;  %v573_v12 = vsel %vm565_vm5, %v548_v58, %v1786_v22 }
  0xbe   : > { %v574_v25 = vmul.f32 %v1886_v8, %v573_v12 }
  0xbf   : > { %699 = vmatpush.msra.mxu2 %v541_v59 }
  0xc1   : > { %466 = vrot.lane.b32.xlu2 %v1725_v11, %s1514_s25  ;;  %429 = vrot.lane.b32.xlu0 %v1708_v9, %s1516_s27 }
  0xc2   : > { %460 = vrot.lane.b32.xlu1 %v1717_v10, %s1514_s25 }
  0xc3   : > { %v1873_v61 = vpop.permute.xlu0 %555  ;;  %v620_v62 = vpop.permute.xlu2 %619 }
  0xc4   : > { %v570_v63 = vsel %vm565_vm5, %v554_v45, %v1873_v61  ;;  %v1883_v5 = vsel %vm627_vm4, %v1753_v13, %v620_v62  ;;  %v1309_v7 = vpop.permute.xlu1 %1308  ;;  %v535_v13 = vsel %vm530_vm8, %v519_v55, %v1835_v46 }
  0xc5   : > { %v1311_v15 = vunpack.i.h.bf16 %v1309_v7  ;;  %v1310_v18 = vunpack.i.l.bf16 %v1309_v7  ;;  %v577_v19 = vmul.f32 %v1871_v60, %v570_v63  ;;  %v542_v22 = vmul.f32 %v1804_v30, %v535_v13 }
  0xc7   : > { %v608_v23 = vsel %vm600_vm7, %v1310_v18, %v1311_v15  ;;  %v607_v24 = vsel %vm600_vm7, %v1311_v15, %v1305_v50  ;;  %718 = vmatpush.msra.mxu3 %v577_v19 }
  0xc8   : > { %657 = vmatpush.msra.mxu0 %v608_v23  ;;  %677 = vmatpush.msra.mxu1 %v607_v24 }
  0xc9   : > { %431 = vrot.lane.b32.xlu2 %v1725_v11, %s1516_s27  ;;  %501 = vrot.lane.b32.xlu0 %v1725_v11, %s1515_s26 }
  0xca   : > { %425 = vrot.lane.b32.xlu1 %v1717_v10, %s1516_s27  ;;  %658 = vmatpush.msra.mxu0 %v574_v25 }
  0xcb   : > { %678 = vmatpush.msra.mxu1 %v575_v14  ;;  %719 = vmatpush.msra.mxu3 %v542_v22  ;;  %v1915_v26 = vpop.permute.xlu2 %421  ;;  %v513_v27 = vpop.permute.xlu0 %512 }
  0xcc   : > { %v515_v31 = vpop.permute.xlu1 %514 }
  0xcd   : > { %v537_v35 = vsel %vm530_vm8, %v515_v31, %v1769_v16  ;;  %v538_v11 = vsel %vm530_vm8, %v513_v27, %v515_v31 }
  0xce   : > { %v539_v36 = vmul.f32 %v1809_v33, %v538_v11  ;;  %v540_v37 = vmul.f32 %v1812_v34, %v537_v35 }
  0xd0   : > { %659 = vmatpush.msra.mxu0 %v539_v36  ;;  %679 = vmatpush.msra.mxu1 %v540_v37 }
  0xd1   : > { %388 = vrot.lane.b32.xlu2 %v1651_v0, %s1517_s28  ;;  %390 = vrot.lane.b32.xlu0 %v1717_v10, %s1517_s28 }
  0xd2   : > { %392 = vrot.lane.b32.xlu1 %v1691_v6, %s1517_s28 }
  0xd3   : > { %v1930_v38 = vpop.permute.xlu2 %458  ;;  %v622_v16 = vpop.permute.xlu0 %621 }
  0xd4   : > { %v1934_v39 = vsel %vm627_vm4, %v620_v62, %v622_v16  ;;  %v624_v40 = vpop.permute.xlu1 %623 }
  0xd5   : > { %v1938_v41 = vsel %vm627_vm4, %v622_v16, %v624_v40 }
  0xd9   : > { %394 = vrot.lane.b32.xlu0 %v1708_v9, %s1517_s28 }
  0xdb   : > { %v1943_v42 = vpop.permute.xlu2 %559  ;;  %v457_v43 = vpop.permute.xlu0 %456 }
  0xdc   : > { %v1319_v45 = vpop.permute.xlu1 %1318  ;;  %v474_v47 = vsel %vm468_vm12, %v1858_v56, %v457_v43 }
  0xdd   : > { %v1321_v48 = vunpack.i.h.bf16 %v1319_v45  ;;  %v1320_v49 = vunpack.i.l.bf16 %v1319_v45  ;;  %v479_v52 = vmul.f32 %v1842_v51, %v474_v47 }
  0xdf   : > { %v509_v50 = vsel %vm503_vm13, %v1320_v49, %v1321_v48 }
  0xe0   : > { %700 = vmatpush.msra.mxu2 %v509_v50  ;;  %v234_v50 = vadd.s32 768, %v1771_v17 }
  0xe2   : > { %701 = vmatpush.msra.mxu2 %v479_v52 }
  0xe3   : > { %v416_v53 = vpop.permute.xlu2 %415  ;;  %v626_v54 = vpop.permute.xlu0 %625 }
  0xe4   : > { %v1955_v55 = vsel %vm627_vm4, %v624_v40, %v626_v54  ;;  %v420_v57 = vpop.permute.xlu1 %419 }
  0xe5   : > { %v439_v58 = vsel %vm433_vm14, %v420_v57, %v1915_v26 }
  0xe6   : > { %v444_v59 = vmul.f32 %v1801_v29, %v439_v58 }
  0xe8   : > { %702 = vmatpush.msra.mxu2 %v444_v59 }
  0xea   : > { %703 = vmatpush.msra.mxu2 %v1654_v1  ;;  %v473_v1 = vsel %vm468_vm12, %v457_v43, %v1930_v38 }
  0xeb   : > { %v451_v62 = vpop.permute.xlu0 %450  ;;  %v1962_v63 = vpop.permute.xlu2 %524  ;;  %v480_v27 = vmul.f32 %v1871_v60, %v473_v1 }
  0xec   : > { %v453_v7 = vpop.permute.xlu1 %452 }
  0xed   : > { %v475_v15 = vsel %vm468_vm12, %v453_v7, %v1858_v56  ;;  %v476_v18 = vsel %vm468_vm12, %v451_v62, %v453_v7 }
  0xee   : > { %v477_v14 = vmul.f32 %v1886_v8, %v476_v18  ;;  %v478_v22 = vmul.f32 %v1900_v21, %v475_v15  ;;  %v1316_v15 = vunpack.i.h.bf16 %v1806_v32 }
  0xf3   : > { %v1324_v12 = vpop.permute.xlu0 %1323  ;;  %v1975_v23 = vpop.permute.xlu2 %563 }
  0xf4   : > { %v1326_v19 = vunpack.i.h.bf16 %v1324_v12  ;;  %v1325_v20 = vunpack.i.l.bf16 %v1324_v12  ;;  %v1969_v13 = vpop.permute.xlu1 %1328 }
  0xf5   : > { %v1330_v29 = vunpack.i.l.bf16 %v1969_v13 }
  0xf6   : > { %v511_v24 = vsel %vm503_vm13, %v1325_v20, %v1326_v19  ;;  %v510_v56 = vsel %vm503_vm13, %v1326_v19, %v1320_v49  ;;  %v233_v49 = vadd.s32 640, %v1771_v17  ;;  %v235_v20 = vadd.s32 896, %v1771_v17 }
  0xf7   : > { %660 = vmatpush.msra.mxu0 %v511_v24  ;;  %680 = vmatpush.msra.mxu1 %v510_v56  ;;  %v508_v25 = vsel %vm503_vm13, %v1321_v48, %v1330_v29 }
  0xf8   : > { %720 = vmatpush.msra.mxu3 %v508_v25 }
  0xf9   : > { %661 = vmatpush.msra.mxu0 %v477_v14  ;;  %681 = vmatpush.msra.mxu1 %v478_v22 }
  0xfa   : > { %721 = vmatpush.msra.mxu3 %v480_v27 }
  0xfb   : > { %v1988_v31 = vpop.permute.xlu0 %561  ;;  %v1992_v11 = vpop.permute.xlu2 %384 }
  0xfc   : > { %v1990_v35 = vpop.permute.xlu1 %1333  ;;  %v567_v1 = vsel %vm565_vm5, %v1943_v42, %v1988_v31 }
  0xfd   : > { %v1336_v59 = vunpack.i.h.bf16 %v1990_v35  ;;  %v1335_v62 = vunpack.i.l.bf16 %v1990_v35 }
  0xff   : > { %v602_v56 = vsel %vm600_vm7, %v1316_v15, %v1335_v62 }
 0x103   : > { %v418_v36 = vpop.permute.xlu0 %417  ;;  %v2011_v52 = vpop.permute.xlu2 %380 }
 0x104   : > { %v440_v37 = vsel %vm433_vm14, %v418_v36, %v420_v57  ;;  %v441_v16 = vsel %vm433_vm14, %v416_v53, %v418_v36  ;;  %v1998_v40 = vpop.permute.xlu1 %423 }
 0x105   : > { %v438_v43 = vsel %vm433_vm14, %v1915_v26, %v1998_v40  ;;  %v442_v45 = vmul.f32 %v1809_v33, %v441_v16  ;;  %v443_v47 = vmul.f32 %v1812_v34, %v440_v37  ;;  %v282_v26 = vand.u32 31, %v234_v50 }
 0x106   : > { %v445_v48 = vmul.f32 %v1804_v30, %v438_v43  ;;  %v275_v30 = vand.u32 31, %v233_v49  ;;  %v289_v37 = vand.u32 31, %v235_v20 }
 0x107   : > { %662 = vmatpush.msra.mxu0 %v442_v45  ;;  %682 = vmatpush.msra.mxu1 %v443_v47  ;;  %vm362_vm0 = vcmp.ne.s32.totalorder %v282_v26, 31  ;;  %vm338_vm3 = vcmp.ne.s32.totalorder %v282_v26, 0 }
 0x108   : > { %722 = vmatpush.msra.mxu3 %v445_v48  ;;  %vm361_vm15 = vcmp.ne.s32.totalorder %v275_v30, 31  ;;  %vm337_vm2 = vcmp.ne.s32.totalorder %v275_v30, 0  ;;  %vm363_vm4 = vcmp.ne.s32.totalorder %v289_v37, 31  ;;  %vm339_vm9 = vcmp.ne.s32.totalorder %v289_v37, 0 }
 0x109   : > { %683 = vmatpush.msra.mxu1 %v1669_v4  ;;  %663 = vmatpush.msra.mxu0 %v1657_v2  ;;  %v2024_v2 = vsel %vm361_vm15, 1.0, %v1518_v28  ;;  %v2084_v49 = vsel %vm363_vm4, 1.0, %v1518_v28 }
 0x10a   : > { %723 = vmatpush.msra.mxu3 %v1666_v3  ;;  %v2027_v3 = vsel %vm362_vm0, 1.0, %v1518_v28  ;;  %v641_v18 = vmul.f32 %v2024_v2, %v1934_v39  ;;  %v2057_v39 = vsel %vm338_vm3, 1.0, %v1518_v28 }
 0x10b   : > { %v2014_v33 = vpop.permute.xlu0 %526  ;;  %v2021_v53 = vpop.permute.xlu2 %462  ;;  %v642_v19 = vmul.f32 %v2027_v3, %v1938_v41  ;;  %v232_v41 = vadd.s32 512, %v1771_v17  ;;  %v580_v22 = vmul.f32 %v2057_v39, %v567_v1 }
 0x10c   : > { %v2016_v34 = vpop.permute.xlu1 %557  ;;  %v532_v24 = vsel %vm530_vm8, %v1962_v63, %v2014_v33 }
 0x10d   : > { %v545_v16 = vmul.f32 %v2027_v3, %v532_v24  ;;  %v268_v45 = vand.u32 31, %v232_v41 }
 0x10f   : > { %vm360_vm6 = vcmp.ne.s32.totalorder %v268_v45, 31  ;;  %vm336_vm10 = vcmp.ne.s32.totalorder %v268_v45, 0 }
 0x110   : > { %v2091_v30 = vsel %vm360_vm6, 1.0, %v1518_v28 }
 0x113   : > { %v2019_v4 = vpop.permute.xlu0 %598  ;;  %v2079_v47 = vpop.permute.xlu2 %427 }
 0x114   : > { %v383_v54 = vpop.permute.xlu1 %382 }
 0x115   : > { %v404_v57 = vsel %vm398_vm1, %v383_v54, %v1992_v11  ;;  %v405_v58 = vsel %vm398_vm1, %v2011_v52, %v383_v54 }
 0x116   : > { %v408_v7 = vmul.f32 %v1900_v21, %v405_v58  ;;  %v409_v12 = vmul.f32 %v1842_v51, %v404_v57  ;;  %v568_v51 = vsel %vm565_vm5, %v2016_v34, %v1943_v42  ;;  %v2054_v21 = vsel %vm337_vm2, 1.0, %v1518_v28  ;;  %v2097_v57 = vld [vmem:[#allocation5] sm:$0xff] }
 0x117   : > { %v603_v42 = vsel %vm600_vm7, %v1336_v59, %v1316_v15  ;;  %v579_v14 = vmul.f32 %v2054_v21, %v568_v51 }
 0x118   : > { %684 = vmatpush.msra.mxu1 %v408_v7  ;;  %704 = vmatpush.msra.mxu2 %v409_v12  ;;  %v2120_v12 = vsel %vm336_vm10, 1.0, %v1518_v28 }
 0x119   : > { %1202 = vmatmul.msk.f32.vlgmr.msra.gmra.mxu2 %vm645_vm11, %v2097_v57  ;;  %1201 = vmatmul.msk.f32.vlgmr.msra.gmra.mxu1 %vm645_vm11, %v2097_v57 }
 0x11a   : > { %756 = vmatpush.msrb.mxu1 %v641_v18  ;;  %776 = vmatpush.msrb.mxu2 %v642_v19 }
 0x11b   : > { %v523_v25 = vpop.permute.xlu0 %522  ;;  %v467_v7 = vpop.permute.xlu2 %466 }
 0x11c   : > { %757 = vmatpush.msrb.mxu1 %v603_v42  ;;  %777 = vmatpush.msrb.mxu2 %v602_v56  ;;  %v533_v27 = vsel %vm530_vm8, %v523_v25, %v1962_v63  ;;  %v529_v36 = vpop.permute.xlu1 %528 }
 0x11d   : > { %v544_v43 = vmul.f32 %v2024_v2, %v533_v27 }
 0x11e   : > { %758 = vmatpush.msrb.mxu1 %v579_v14  ;;  %778 = vmatpush.msrb.mxu2 %v580_v22 }
 0x120   : > { %779 = vmatpush.msrb.mxu2 %v545_v16  ;;  %759 = vmatpush.msrb.mxu1 %v544_v43 }
 0x123   : > { %v2081_v48 = vpop.permute.xlu0 %386  ;;  %v432_v1 = vpop.permute.xlu2 %431 }
 0x124   : > { %v403_v63 = vsel %vm398_vm1, %v1992_v11, %v2081_v48  ;;  %v397_v50 = vpop.permute.xlu1 %396  ;;  %v643_v11 = vmul.f32 %v2084_v49, %v1955_v55  ;;  %v569_v55 = vsel %vm565_vm5, %v1873_v61, %v2016_v34  ;;  %v534_v61 = vsel %vm530_vm8, %v1835_v46, %v523_v25 }
 0x125   : > { %v406_v26 = vsel %vm398_vm1, %v397_v50, %v2011_v52  ;;  %v410_v54 = vmul.f32 %v1871_v60, %v403_v63  ;;  %v566_v60 = vsel %vm565_vm5, %v1988_v31, %v1975_v23  ;;  %v640_v52 = vmul.f32 %v2091_v30, %v1883_v5 }
 0x126   : > { %v407_v58 = vmul.f32 %v1886_v8, %v406_v26  ;;  %v2113_v8 = vsel %vm339_vm9, 1.0, %v1518_v28  ;;  %v531_v23 = vsel %vm530_vm8, %v2014_v33, %v529_v36  ;;  %v601_v5 = vsel %vm600_vm7, %v1335_v62, %v2019_v4 }
 0x127   : > { %724 = vmatpush.msra.mxu3 %v410_v54  ;;  %v604_v28 = vsel %vm600_vm7, %v1315_v44, %v1336_v59  ;;  %v581_v31 = vmul.f32 %v2113_v8, %v566_v60  ;;  %v578_v34 = vmul.f32 %v2120_v12, %v569_v55  ;;  %v1331_v4 = vunpack.i.h.bf16 %v1969_v13 }
 0x128   : > { %664 = vmatpush.msra.mxu0 %v407_v58  ;;  %1203 = vmatmul.msk.f32.vlgmr.msra.gmra.mxu3 %vm645_vm11, %v2097_v57  ;;  %v546_v35 = vmul.f32 %v2084_v49, %v531_v23  ;;  %v543_v62 = vmul.f32 %v2091_v30, %v534_v61 }
 0x129   : > { %796 = vmatpush.msrb.mxu3 %v643_v11  ;;  %1200 = vmatmul.msk.f32.vlgmr.msra.gmra.mxu0 %vm645_vm11, %v2097_v57 }
 0x12a   : > { %736 = vmatpush.msrb.mxu0 %v640_v52 }
 0x12b   : > { %797 = vmatpush.msrb.mxu3 %v601_v5  ;;  %v465_v33 = vpop.permute.xlu0 %464 }
 0x12c   : > { %737 = vmatpush.msrb.mxu0 %v604_v28  ;;  %v1339_v46 = vpop.permute.xlu1 %1338  ;;  %v470_v32 = vsel %vm468_vm12, %v2021_v53, %v465_v33  ;;  %v469_v14 = vsel %vm468_vm12, %v465_v33, %v467_v7 }
 0x12d   : > { %798 = vmatpush.msrb.mxu3 %v581_v31  ;;  %v1341_v44 = vunpack.i.h.bf16 %v1339_v46  ;;  %v1340_v59 = vunpack.i.l.bf16 %v1339_v46  ;;  %v483_v20 = vmul.f32 %v2057_v39, %v470_v32  ;;  %v484_v37 = vmul.f32 %v2113_v8, %v469_v14 }
 0x12e   : > { %738 = vmatpush.msrb.mxu0 %v578_v34 }
 0x12f   : > { %799 = vmatpush.msrb.mxu3 %v546_v35  ;;  %v506_v15 = vsel %vm503_vm13, %v1341_v44, %v1331_v4  ;;  %v505_v18 = vsel %vm503_vm13, %v1331_v4, %v1340_v59  ;;  %v507_v19 = vsel %vm503_vm13, %v1330_v29, %v1341_v44 }
 0x130   : > { %739 = vmatpush.msrb.mxu0 %v543_v62  ;;  %760 = vmatpush.msrb.mxu1 %v506_v15 }
 0x131   : > { %780 = vmatpush.msrb.mxu2 %v505_v18 }
 0x132   : > { %740 = vmatpush.msrb.mxu0 %v507_v19 }
 0x133   : > { %781 = vmatpush.msrb.mxu2 %v483_v20  ;;  %v430_v51 = vpop.permute.xlu0 %429 }
 0x134   : > { %v435_v41 = vsel %vm433_vm14, %v2079_v47, %v430_v51  ;;  %v461_v24 = vpop.permute.xlu1 %460  ;;  %v434_v27 = vsel %vm433_vm14, %v430_v51, %v432_v1 }
 0x135   : > { %v471_v13 = vsel %vm468_vm12, %v461_v24, %v2021_v53  ;;  %v472_v29 = vsel %vm468_vm12, %v1930_v38, %v461_v24  ;;  %v448_v42 = vmul.f32 %v2027_v3, %v435_v41  ;;  %v389_v53 = vpop.permute.xlu2 %388  ;;  %v449_v63 = vmul.f32 %v2084_v49, %v434_v27 }
 0x136   : > { %v481_v56 = vmul.f32 %v2120_v12, %v472_v29  ;;  %v482_v25 = vmul.f32 %v2054_v21, %v471_v13  ;;  %v402_v45 = vsel %vm398_vm1, %v2081_v48, %v389_v53 }
 0x137   : > { %782 = vmatpush.msrb.mxu2 %v448_v42 }
 0x138   : > { %741 = vmatpush.msrb.mxu0 %v481_v56  ;;  %761 = vmatpush.msrb.mxu1 %v482_v25 }
 0x139   : > { %783 = vmatpush.msrb.mxu2 %v1691_v6 }
 0x13b   : > { %v502_v22 = vpop.permute.xlu0 %501 }
 0x13c   : > { %v426_v38 = vpop.permute.xlu1 %425  ;;  %v504_v3 = vsel %vm503_vm13, %v1340_v59, %v502_v22  ;;  %vm896_vm13 = vcmask 64512  }
 0x13d   : > { %v436_v36 = vsel %vm433_vm14, %v426_v38, %v2079_v47  ;;  %v437_v6 = vsel %vm433_vm14, %v1998_v40, %v426_v38  ;;  %800 = vmatpush.msrb.mxu3 %v504_v3  ;;  %v411_v40 = vmul.f32 %v2120_v12, %v402_v45 }
 0x13e   : > { %v446_v16 = vmul.f32 %v2091_v30, %v437_v6  ;;  %v447_v43 = vmul.f32 %v2024_v2, %v436_v36 }
 0x13f   : > { %801 = vmatpush.msrb.mxu3 %v484_v37 }
 0x140   : > { %742 = vmatpush.msrb.mxu0 %v446_v16  ;;  %762 = vmatpush.msrb.mxu1 %v447_v43 }
 0x141   : > { %802 = vmatpush.msrb.mxu3 %v449_v63 }
 0x142   : > { %743 = vmatpush.msrb.mxu0 %v1651_v0  ;;  %763 = vmatpush.msrb.mxu1 %v1717_v10 }
 0x143   : > { %v391_v47 = vpop.permute.xlu0 %390  ;;  %803 = vmatpush.msrb.mxu3 %v1708_v9 }
 0x144   : > { %v401_v2 = vsel %vm398_vm1, %v389_v53, %v391_v47  ;;  %v393_v50 = vpop.permute.xlu1 %392  ;;  %744 = vmatpush.msrb.mxu0 %v411_v40 }
 0x145   : > { %v400_v48 = vsel %vm398_vm1, %v391_v47, %v393_v50  ;;  %v412_v49 = vmul.f32 %v2054_v21, %v401_v2  ;;  %1204 = vmatmul.msk.f32.vlgmr.msrb.gmra.mxu0 %vm645_vm11, %v2097_v57 }
 0x146   : > { %v413_v0 = vmul.f32 %v2057_v39, %v400_v48 }
 0x147   : > { %764 = vmatpush.msrb.mxu1 %v412_v49 }
 0x148   : > { %784 = vmatpush.msrb.mxu2 %v413_v0  ;;  %1205 = vmatmul.msk.f32.vlgmr.msrb.gmra.mxu1 %vm645_vm11, %v2097_v57 }
 0x149   : > { %1206 = vmatmul.msk.f32.vlgmr.msrb.gmra.mxu2 %vm645_vm11, %v2097_v57 }
 0x14b   : > { %v395_v9 = vpop.permute.xlu0 %394 }
 0x14c   : > { %v399_v10 = vsel %vm398_vm1, %v393_v50, %v395_v9 }
 0x14d   : > { %v414_v30 = vmul.f32 %v2113_v8, %v399_v10  ;;  %v1519_v8 = vmov 1024.0  }
 0x14e   : > { %1342 = vrcp.f32 %v1519_v8 }
 0x14f   : > { %804 = vmatpush.msrb.mxu3 %v414_v30 }
 0x150   : > { %1207 = vmatmul.msk.f32.vlgmr.msrb.gmra.mxu3 %vm645_vm11, %v2097_v57 }
 0x154   : > { %v1343_v28 = vpop.eup %1342 }
 0x155   : > { %v819_v57 = vmul.f32 1024.0, %v1343_v28  ;;  %vm823_vm5 = vweird.f32 %v1343_v28 }
 0x157   : > { %v820_v31 = vsub.f32 1.0, %v819_v57 }
 0x159   : > { %v821_v33 = vmul.f32 %v1343_v28, %v820_v31 }
 0x15b   : > { %v822_v34 = vadd.f32 %v1343_v28, %v821_v33 }
 0x15d   : > { %v824_v4 = vsel %vm823_vm5, %v1343_v28, %v822_v34 }
 0x196   : > { %v686_v21 = vpop.f32.mrf.mxu1 }
 0x19c   : > { %v706_v54 = vpop.f32.mrf.mxu2 }
 0x1a6   : > { %v666_v39 = vpop.f32.mrf.mxu0 }
 0x1a7   : > { %v809_v26 = vadd.f32 %v686_v21, %v666_v39 }
 0x1a9   : > { %v810_v58 = vadd.f32 %v809_v26, %v706_v54 }
 0x1ab   : > { %v726_v11 = vpop.f32.mrf.mxu3 }
 0x1ac   : > { %v811_v60 = vadd.f32 %v810_v58, %v726_v11 }
 0x1c2   : > { %v746_v52 = vpop.f32.mrf.mxu0 }
 0x1c3   : > { %v812_v55 = vadd.f32 %v811_v60, %v746_v52 }
 0x1c5   : > { %v766_v7 = vpop.f32.mrf.mxu1 }
 0x1c6   : > { %v813_v12 = vadd.f32 %v812_v55, %v766_v7  ;;  %v895_v55 = vld [vmem:[#allocation7] sm:$0xff] }
 0x1cc   : > { %v786_v23 = vpop.f32.mrf.mxu2 }
 0x1cd   : > { %v814_v17 = vadd.f32 %v813_v12, %v786_v23 }
 0x1d3   : > { %v806_v5 = vpop.f32.mrf.mxu3 }
 0x1d4   : > { %v815_v61 = vadd.f32 %v814_v17, %v806_v5 }
 0x1d6   : > { %816 = vadd.xlane.f32.xlu1 %v815_v61 }
 0x249   : > { %v817_v46 = vpop.xlane.xlu1 %816 }
 0x24a   : > { %v825_v35 = vmul.f32 %v824_v4, %v817_v46 }
 0x24c   : > { %v826_v32 = vsub.f32 %v666_v39, %v825_v35  ;;  %v827_v44 = vsub.f32 %v686_v21, %v825_v35  ;;  %v828_v59 = vsub.f32 %v706_v54, %v825_v35  ;;  %v829_v62 = vsub.f32 %v726_v11, %v825_v35 }
 0x24d   : > { %v830_v19 = vsub.f32 %v746_v52, %v825_v35  ;;  %v831_v51 = vsub.f32 %v766_v7, %v825_v35  ;;  %v832_v13 = vsub.f32 %v786_v23, %v825_v35  ;;  %v833_v56 = vsub.f32 %v806_v5, %v825_v35 }
 0x24e   : > { %v834_v15 = vmul.f32 %v826_v32, %v826_v32  ;;  %v835_v18 = vmul.f32 %v827_v44, %v827_v44  ;;  %v836_v20 = vmul.f32 %v828_v59, %v828_v59  ;;  %v837_v41 = vmul.f32 %v829_v62, %v829_v62 }
 0x24f   : > { %v838_v29 = vmul.f32 %v830_v19, %v830_v19  ;;  %v839_v25 = vmul.f32 %v831_v51, %v831_v51  ;;  %v840_v22 = vmul.f32 %v832_v13, %v832_v13  ;;  %v841_v27 = vmul.f32 %v833_v56, %v833_v56 }
 0x250   : > { %v842_v1 = vadd.f32 %v835_v18, %v834_v15 }
 0x252   : > { %v843_v24 = vadd.f32 %v842_v1, %v836_v20 }
 0x254   : > { %v844_v42 = vadd.f32 %v843_v24, %v837_v41 }
 0x256   : > { %v845_v14 = vadd.f32 %v844_v42, %v838_v29 }
 0x258   : > { %v846_v53 = vadd.f32 %v845_v14, %v839_v25 }
 0x25a   : > { %v847_v38 = vadd.f32 %v846_v53, %v840_v22 }
 0x25c   : > { %v848_v3 = vadd.f32 %v847_v38, %v841_v27 }
 0x25e   : > { %849 = vadd.xlane.f32.xlu2 %v848_v3 }
 0x2d1   : > { %v850_v36 = vpop.xlane.xlu2 %849 }
 0x2d2   : > { %v851_v6 = vmul.f32 %v850_v36, %v824_v4 }
 0x2d4   : > { %v852_v37 = vadd.f32 1e-05, %v851_v6 }
 0x2d6   : > { %1344 = vrsqrt.f32 %v852_v37  ;;  %vm859_vm8 = vweird.f32 %v852_v37 }
 0x2dc   : > { %v1345_v16 = vpop.eup %1344 }
 0x2dd   : > { %v854_v43 = vmul.f32 %v1345_v16, %v852_v37  ;;  %vm860_vm7 = vweird.f32 %v1345_v16 }
 0x2de   : > { %vm861_vm12 = vmor %vm859_vm8, %vm860_vm7 }
 0x2df   : > { %v855_v45 = vmul.f32 %v1345_v16, %v854_v43 }
 0x2e1   : > { %v856_v63 = vmul.f32 0.5, %v855_v45 }
 0x2e3   : > { %v857_v40 = vsub.f32 1.5, %v856_v63 }
 0x2e5   : > { %v858_v47 = vmul.f32 %v1345_v16, %v857_v40 }
 0x2e7   : > { %v862_v2 = vsel %vm861_vm12, %v1345_v16, %v858_v47 }
 0x2e8   : > { %v863_v50 = vmul.f32 %v862_v2, %v826_v32  ;;  %v864_v48 = vmul.f32 %v862_v2, %v827_v44  ;;  %v865_v49 = vmul.f32 %v862_v2, %v828_v59  ;;  %v866_v0 = vmul.f32 %v862_v2, %v829_v62 }
 0x2e9   : > { %v867_v9 = vmul.f32 %v862_v2, %v830_v19  ;;  %v868_v10 = vmul.f32 %v862_v2, %v831_v51  ;;  %v869_v30 = vmul.f32 %v862_v2, %v832_v13  ;;  %v870_v21 = vmul.f32 %v862_v2, %v833_v56 }
 0x2ea   : > { %vm871_vm14 = vcmp.gt.f32.partialorder %v863_v50, 0.0  ;;  %v879_v39 = vmul.f32 0.1, %v863_v50  ;;  %vm872_vm15 = vcmp.gt.f32.partialorder %v864_v48, 0.0  ;;  %v880_v26 = vmul.f32 0.1, %v864_v48 }
 0x2eb   : > { %vm873_vm0 = vcmp.gt.f32.partialorder %v865_v49, 0.0  ;;  %v881_v54 = vmul.f32 0.1, %v865_v49  ;;  %vm874_vm1 = vcmp.gt.f32.partialorder %v866_v0, 0.0  ;;  %v882_v58 = vmul.f32 0.1, %v866_v0 }
 0x2ec   : > { %v887_v11 = vsel %vm871_vm14, %v863_v50, %v879_v39  ;;  %v888_v60 = vsel %vm872_vm15, %v864_v48, %v880_v26  ;;  %vm875_vm2 = vcmp.gt.f32.partialorder %v867_v9, 0.0  ;;  %v883_v52 = vmul.f32 0.1, %v867_v9 }
 0x2ed   : > { %915 = vmatpush.msra.mxu0 %v887_v11  ;;  %935 = vmatpush.msra.mxu1 %v888_v60  ;;  %v889_v7 = vsel %vm873_vm0, %v865_v49, %v881_v54  ;;  %v890_v12 = vsel %vm874_vm1, %v866_v0, %v882_v58  ;;  %vm876_vm3 = vcmp.gt.f32.partialorder %v868_v10, 0.0  ;;  %v884_v23 = vmul.f32 0.1, %v868_v10 }
 0x2ee   : > { %955 = vmatpush.msra.mxu2 %v889_v7  ;;  %975 = vmatpush.msra.mxu3 %v890_v12  ;;  %v891_v17 = vsel %vm875_vm2, %v867_v9, %v883_v52  ;;  %vm877_vm4 = vcmp.gt.f32.partialorder %v869_v30, 0.0  ;;  %v885_v5 = vmul.f32 0.1, %v869_v30  ;;  %vm878_vm6 = vcmp.gt.f32.partialorder %v870_v21, 0.0 }
 0x2ef   : > { %995 = vmatpush.msrb.mxu0 %v891_v17  ;;  %v892_v61 = vsel %vm876_vm3, %v868_v10, %v884_v23  ;;  %v886_v8 = vmul.f32 0.1, %v870_v21  ;;  %1210 = vmatmul.msk.f32.vlgmr.msra.gmra.mxu2 %vm896_vm13, %v895_v55 }
 0x2f0   : > { %1015 = vmatpush.msrb.mxu1 %v892_v61  ;;  %v893_v28 = vsel %vm877_vm4, %v869_v30, %v885_v5  ;;  %1211 = vmatmul.msk.f32.vlgmr.msra.gmra.mxu3 %vm896_vm13, %v895_v55 }
 0x2f1   : > { %1035 = vmatpush.msrb.mxu2 %v893_v28  ;;  %v894_v57 = vsel %vm878_vm6, %v870_v21, %v886_v8  ;;  %1208 = vmatmul.msk.f32.vlgmr.msra.gmra.mxu0 %vm896_vm13, %v895_v55 }
 0x2f2   : > { %1055 = vmatpush.msrb.mxu3 %v894_v57  ;;  %1209 = vmatmul.msk.f32.vlgmr.msra.gmra.mxu1 %vm896_vm13, %v895_v55 }
 0x2f7   : > { %1214 = vmatmul.msk.f32.vlgmr.msrb.gmra.mxu2 %vm896_vm13, %v895_v55 }
 0x2f8   : > { %1215 = vmatmul.msk.f32.vlgmr.msrb.gmra.mxu3 %vm896_vm13, %v895_v55 }
 0x2f9   : > { %1212 = vmatmul.msk.f32.vlgmr.msrb.gmra.mxu0 %vm896_vm13, %v895_v55 }
 0x2fa   : > { %1213 = vmatmul.msk.f32.vlgmr.msrb.gmra.mxu1 %vm896_vm13, %v895_v55 }
 0x36e   : > { %v917_v31 = vpop.f32.mrf.mxu0 }
 0x36f   : > { %1060 = vst [vmem:[%s217_s30] sm:$0xff] %v917_v31  ;;  %v937_v33 = vpop.f32.mrf.mxu1 }
 0x370   : > { %1061 = vst [vmem:[%s217_s30 + $0x8] sm:$0xff] %v937_v33 }
 0x372   : > { %v957_v34 = vpop.f32.mrf.mxu2 }
 0x373   : > { %1062 = vst [vmem:[%s217_s30 + $0x10] sm:$0xff] %v957_v34  ;;  %v977_v4 = vpop.f32.mrf.mxu3 }
 0x374   : > { %1063 = vst [vmem:[%s217_s30 + $0x18] sm:$0xff] %v977_v4 }
 0x376   : > { %v997_v46 = vpop.f32.mrf.mxu0 }
 0x377   : > { %1064 = vst [vmem:[%s217_s30 + $0x20] sm:$0xff] %v997_v46  ;;  %v1017_v35 = vpop.f32.mrf.mxu1 }
 0x378   : > { %1065 = vst [vmem:[%s217_s30 + $0x28] sm:$0xff] %v1017_v35 }
 0x37a   : > { %v1037_v32 = vpop.f32.mrf.mxu2 }
 0x37b   : > { %1066 = vst [vmem:[%s217_s30 + $0x30] sm:$0xff] %v1037_v32  ;;  %v1057_v44 = vpop.f32.mrf.mxu3 }
 0x37c   : > { %1067 = vst [vmem:[%s217_s30 + $0x38] sm:$0xff] %v1057_v44 }
 0x37d   : > { %1463 = shalt.err (!%p1460_p11)
}
 0x37e   : > { %1235 = dma.vmem_to_hbm [thread:$0]  (%p1606_p3), %s1083_s10, 1024, %s1085_s21, %s1069_s16  }
 0x37f PF: > { %s1096_s9 = sand.u32 1, %s1494_s12   ;;  %p2264_p12 = scmp.ge.s32.totalorder %s1506_s15, 2 }
 0x380   : > { %s1097_s27 = scalar_lea.sflag [#allocation4], %s1096_s9 }
 0x381   : > { %p1249_p13 = pnand %p2264_p12, %p1575_p6 }
 0x383   : > { %p1250_p0 = pneg %p1249_p13 }
 0x385   : > { %1489 = dma.done.wait (%p1250_p0), %s1097_s27, 1024  }
 0x386   : > { %1491 = vsyncadd (%p1250_p0), %s1097_s27, 4294966272  ;;  %p17_p5 = scmp.ge.s32.totalorder %s1596_s4, 4   ;;  %s2265_s12 = smov %s1498_s13 }
 0x387   : > { %s2266_s13 = smov %s1502_s14  ;;  %s2267_s14 = smov %s1612_s8 }
 0x388   : > { %s2268_s15 = smov %s1596_s4  ;;  %19 = sbr.rel (!%p17_p5) target bundleno = 6 (0x6), region = 85 }
 0x38d   :  { %1103 = vsyncpa [#allocation3], 1 }
 0x38e   :  { %1105 = vsyncpa [#allocation3 + $0x1], 1 }
 0x38f   :  { %1106 = vsyncpa [#allocation6], 1 }
 0x390   :  { %1107 = vsyncpa [#allocation4], 1 }
 0x391   :  { %1109 = vsyncpa [#allocation4 + $0x1], 1 }

</bundles_post_ra>
